<compile_context>
chip_gen: v6e
topology: v6e:2x2x1
jax: 0.10.0
libtpu: 0.0.40
codegen_flags: <defaults>
</compile_context>

<pallas_src>
import functools

import jax
import jax.numpy as jnp
from jax.experimental import pallas as pl
from jax.experimental.pallas import tpu as pltpu


def _sigmoid_kernel(x_ref, o_ref):
    # Elementwise sigmoid on the whole VMEM-resident tile.
    # Keep the math in f32 (v5e has no bf16 VPU/EUP), cast back to out dtype.
    x = x_ref[...].astype(jnp.float32)
    o_ref[...] = jax.nn.sigmoid(x).astype(o_ref.dtype)


@functools.partial(jax.jit, static_argnames=())
def sigmoid_pallas(x):
    """Elementwise sigmoid on an NCHW tensor (H=W=1), computed in a Pallas kernel."""
    n, c, h, w = x.shape
    # Lane-dense 2-D slab: channels on the 128-wide lane axis. Under jit this
    # reshape is a free bitcast.
    x2d = x.reshape(n, c * h * w)

    nelems = n * c * h * w
    itemsize = jnp.dtype(x.dtype).itemsize

    out2d = pl.pallas_call(
        _sigmoid_kernel,
        out_shape=jax.ShapeDtypeStruct(x2d.shape, x2d.dtype),
        # Grid-less call: whole array lives in VMEM, single DMA in / single DMA out.
        in_specs=[pl.BlockSpec(memory_space=pltpu.MemorySpace.VMEM)],
        out_specs=pl.BlockSpec(memory_space=pltpu.MemorySpace.VMEM),
        # Let XLA fuse/schedule around this tiny custom call instead of
        # treating it as an opaque barrier.
        compiler_params=pltpu.CompilerParams(allow_input_fusion=[True]),
        cost_estimate=pl.CostEstimate(
            flops=nelems,
            transcendentals=nelems,
            bytes_accessed=2 * nelems * itemsize,
        ),
    )(x2d)

    return out2d.reshape(n, c, h, w)


if __name__ == "__main__":
    key = jax.random.PRNGKey(0)
    # Matches the module's forward input: torch.randn([1, 480, 1, 1])
    x251 = jax.random.normal(key, (1, 480, 1, 1), dtype=jnp.float32)

    # Compute the reference before the kernel call (robust even if the input
    # were ever donated).
    ref = jax.nn.sigmoid(x251)

    out = sigmoid_pallas(x251)
    jax.block_until_ready(out)

    assert out.shape == (1, 480, 1, 1)
    assert jnp.allclose(out, ref, atol=1e-6), "mismatch vs reference sigmoid"

    print("KERNEL_OK")
</pallas_src>

<mosaic_0001>
module attributes {stable_mosaic.version = 11 : i64} {
  func.func @_sigmoid_kernel(%arg0: memref<1x480xf32, #tpu.memory_space<vmem>>, %arg1: memref<1x480xf32, #tpu.memory_space<vmem>>) attributes {dimension_semantics = [], scalar_prefetch = 0 : i64, scratch_operands = 0 : i64, tpu.core_type = #tpu.core_type<tc>} {
    %c0 = arith.constant 0 : index
    %c0_0 = arith.constant 0 : index
    %0 = vector.load %arg0[%c0, %c0_0] : memref<1x480xf32, #tpu.memory_space<vmem>>, vector<1x480xf32>
    %1 = arith.negf %0 : vector<1x480xf32>
    %2 = math.exp %1 : vector<1x480xf32>
    %cst = arith.constant 1.000000e+00 : f32
    %3 = vector.broadcast %cst : f32 to vector<1x480xf32>
    %4 = arith.addf %3, %2 : vector<1x480xf32>
    %5 = arith.divf %3, %4 : vector<1x480xf32>
    %c0_1 = arith.constant 0 : index
    %c0_2 = arith.constant 0 : index
    %6 = vector.load %arg1[%c0_1, %c0_2] : memref<1x480xf32, #tpu.memory_space<vmem>>, vector<1x480xf32>
    tpu.vector_store %arg1[%c0_1, %c0_2], %5 {strides = array<i32>} : memref<1x480xf32, #tpu.memory_space<vmem>>, vector<1x480xf32>,
    return
  }
}

</mosaic_0001>

<bundles_post_ra>
// kernel: sigmoid_pallas.2
= control target key start
LH: loop header
LB: loop body
LE: loop exit
PB: predicated region body
PF: predicated region fallthrough
CT: control target
= control target key end

     0   :  { %6 = vsyncpa [#allocation3], 0  ;;  %v38_v5 = vlaneseq  ;;  %s88_s8 = smov [#allocation2]   ;;  %s105_s0 = inlined_call_operand.vmem [shape: f32[1,480,1,1], index: 0, kind: input, shape index: {}]   ;;  %s106_s1 = inlined_call_operand.hbm [shape: f32[1,480], index: 1, kind: output, shape index: {}]  }
   0x1   :  { %v9_v0 = vld [vmem:[%s105_s0] sm:$0xf]   ;;  %s49_s9 = sshll.u32 %s88_s8, 4  ;;  %s50_s9 = int_to_ptr.vmem [resolvable:$true] %s49_s9 }
   0x2   :  { %12 = vst [vmem:[#allocation4] sm:$0xf] %v9_v0   ;;  %vm40_vm0 = vcmp.lt.s32.totalorder %v38_v5, 480  ;;  %s66_s10 = scalar_lea.vmem %s50_s9, 64  ;;  %p71_p1 = scmp.lt.s32.totalorder %s50_s9, %s50_s9 }
   0x3   :  { %p67_p0 = scmp.ne.s32.totalorder %s50_s9, %s66_s10  ;;  %p72_p2 = scmp.lt.s32.totalorder %s66_s10, %s66_s10 }
   0x5   :  { %p73_p3 = por %p72_p2, %p71_p1 }
   0x7   :  { %p74_p4 = pnand %p73_p3, %p67_p0 }
   0x9   :  { %v31_v1 = vld [vmem:[#allocation4] sm:$0xf] }
   0xa   :  { %v60_v2 = vmul.f32 -1.442695, %v31_v1 }
   0xc   :  { %62 = vpow2.f32 %v60_v2 }
  0x19   :  { %v63_v3 = vpop.eup %62 }
  0x1a   :  { %v35_v4 = vadd.f32 1.0, %v63_v3 }
  0x1c   :  { %64 = vrcp.f32 %v35_v4 }
  0x29   :  { %v65_v6 = vpop.eup %64 }
  0x2a   :  { %42 = vst.msk [vmem:[#allocation2] sm:$0xf] %vm40_vm0, %v65_v6 }
  0x2b   :  { %77 = shalt.err (!%p74_p4)
}
  0x2c   :  { %52 = dma.vmem_to_hbm [thread:$0]  %s50_s9, 64, %s106_s1, [#allocation3]  }
  0x2d   :  { %86 = dma.done.wait [#allocation3], 64  }
  0x2e   :  { %87 = vsyncadd [#allocation3], 4294967232 }
  0x2f   :  { %56 = vsyncpa [#allocation3], 1 }

</bundles_post_ra>
